<compile_context>
chip_gen: v6e
topology: v6e:2x2x1
jax: 0.10.0
libtpu: 0.0.40
codegen_flags: <defaults>
</compile_context>

<pallas_src>
import functools
import math

import jax
import jax.numpy as jnp
from jax.experimental import pallas as pl
from jax.experimental.pallas import tpu as pltpu

BETA_MIN = 0.1
BETA_MAX = 20.0

LANE = 128                               # TPU lane width
# ~4 MiB per stream per block is well amortized on v5e/v6e; on v7x (3.2 TB/s) this
# could be raised to ~8 MiB (or pipeline_mode=pl.Buffered(3)) to shave per-step
# overhead -- kept at 4 MiB as the safe all-generation default.
TARGET_BLOCK_BYTES = 4 * 1024 * 1024
VMEM_LIMIT_BYTES = 48 * 1024 * 1024      # headroom under v7x's 64 MiB physical VMEM
MIN_PARALLEL_BLOCKS = 8                  # keep the grid shardable across TCs (v7x)


def _round_up(a, m):
    return -(-a // m) * m


# ---------------------------------------------------------------------------
# Layout planning: (N, D) -> (N, R_pad, 128), tiled as (TB, TR, 128) blocks.
# ---------------------------------------------------------------------------
def _layout_plan(n, d, itemsize):
    sub = max(8, 32 // itemsize)                       # sublane multiple for dtype
    rows = -(-d // LANE)                               # 128-lane rows needed
    rows_target = max(sub, (TARGET_BLOCK_BYTES // (LANE * itemsize)) // sub * sub)
    chunks = -(-rows // rows_target)                   # chunk count first ...
    tr = _round_up(-(-rows // chunks), sub)            # ... so last chunk is ~full
    rows_pad = chunks * tr

    # Batches per block: fill toward TARGET_BLOCK_BYTES but keep enough grid
    # parallelism.  TB must divide N (no batch padding / extra copies).
    per_batch_bytes = tr * LANE * itemsize
    tb_cap = max(1, TARGET_BLOCK_BYTES // per_batch_bytes)
    tb = 1
    for cand in range(1, n + 1):
        if n % cand or cand > tb_cap:
            continue
        if cand == 1 or (n // cand) * chunks >= MIN_PARALLEL_BLOCKS:
            tb = cand
    return rows_pad, tr, chunks, tb


def _to_rows(x2, rows_pad):
    """(N, D) -> (N, rows_pad, 128); pads only when D doesn't already tile."""
    n, d = x2.shape
    d_pad = rows_pad * LANE
    if d_pad != d:
        x2 = jnp.pad(x2, ((0, 0), (0, d_pad - d)))
    return x2.reshape(n, rows_pad, LANE)


def _from_rows(x3, shape, d):
    n = shape[0]
    d_pad = x3.shape[1] * LANE
    x2 = x3.reshape(n, d_pad)
    if d_pad != d:
        x2 = x2[:, :d]
    return x2.reshape(shape)


# ---------------------------------------------------------------------------
# Kernels
# ---------------------------------------------------------------------------
def _drift_kernel(t_ref, x_ref, f_ref):
    """f(x, t) = -0.5 * beta(t) * x on one (TB, TR, 128) block."""
    beta = BETA_MIN + t_ref[...] * (BETA_MAX - BETA_MIN)       # (TB,1,1) f32
    x = x_ref[...].astype(jnp.float32)                         # widen for v5e VPU
    f_ref[...] = ((-0.5) * beta * x).astype(f_ref.dtype)


def _euler_kernel(a_ref, s_ref, x_ref, dw_ref, o_ref):
    """x_next = a*x + s*dw, with per-batch a = 1 - 0.5*beta*dt, s = sqrt(beta*|dt|)."""
    x = x_ref[...].astype(jnp.float32)
    dw = dw_ref[...].astype(jnp.float32)
    o_ref[...] = (a_ref[...] * x + s_ref[...] * dw).astype(o_ref.dtype)


def _euler_last_kernel(a_ref, x_ref, o_ref):
    """Deterministic last step: x_next = a*x (noise term dropped)."""
    o_ref[...] = (a_ref[...] * x_ref[...].astype(jnp.float32)).astype(o_ref.dtype)


def _fused_euler_kernel(a_ref, s_ref, x_ref, dw_ref, o_ref):
    """K fused Euler steps; the state lives in the resident output block (VMEM)
    across the trailing 'arbitrary' step axis.  Per step only dw is DMA'd."""
    step = pl.program_id(2)

    @pl.when(step == 0)
    def _():
        o_ref[...] = x_ref[...]

    a = a_ref[step]                                   # per-step scalars from SMEM
    sig = s_ref[step]
    state = o_ref[...].astype(jnp.float32)
    o_ref[...] = (a * state + sig * dw_ref[0].astype(jnp.float32)).astype(o_ref.dtype)


# ---------------------------------------------------------------------------
# Wrappers
# ---------------------------------------------------------------------------
@jax.jit
def sde_forward(x, t):
    """Pallas equivalent of StochasticDifferentialEquation.forward (VP-SDE).

    Returns (f, g_scale): f = -0.5*beta(t)*x has x's shape/dtype; g_scale has shape
    (N, 1, ..., 1) (f32) and is the diagonal scale of the diffusion LinearSystem
    G(x, t) = g_scale * Identity (apply it to v as g_scale * v)."""
    n = x.shape[0]
    d = math.prod(x.shape[1:])
    rows_pad, tr, chunks, tb = _layout_plan(n, d, x.dtype.itemsize)
    x3 = _to_rows(x.reshape(n, d), rows_pad)
    t1 = jnp.asarray(t, jnp.float32).reshape(n)
    t3 = t1.reshape(n, 1, 1)

    blk = pl.BlockSpec((tb, tr, LANE), lambda b, c: (b, c, 0))
    coef = pl.BlockSpec((tb, 1, 1), lambda b, c: (b, 0, 0))

    f3 = pl.pallas_call(
        _drift_kernel,
        out_shape=jax.ShapeDtypeStruct(x3.shape, x3.dtype),
        grid_spec=pltpu.PrefetchScalarGridSpec(
            num_scalar_prefetch=0,
            grid=(n // tb, chunks),
            in_specs=[coef, blk],
            out_specs=blk,
        ),
        compiler_params=pltpu.CompilerParams(
            dimension_semantics=("parallel", "parallel"),
            vmem_limit_bytes=VMEM_LIMIT_BYTES),
    )(t3, x3)

    f = _from_rows(f3, x.shape, d)
    beta = BETA_MIN + t1 * (BETA_MAX - BETA_MIN)
    g_scale = jnp.sqrt(beta).reshape((n,) + (1,) * (x.ndim - 1))
    return f, g_scale


def _euler_step_impl(x, t, dt, noise=None, last_step=False):
    """Fused Euler-Maruyama step x_next = x + f(x,t)*dt + G(x,t) dw.

    `noise` is a standard-normal array shaped like x (dw = sqrt(|dt|)*noise).
    With last_step=True the noise term is dropped (matching _sample_step_euler)."""
    n = x.shape[0]
    d = math.prod(x.shape[1:])
    rows_pad, tr, chunks, tb = _layout_plan(n, d, x.dtype.itemsize)
    x3 = _to_rows(x.reshape(n, d), rows_pad)
    t1 = jnp.asarray(t, jnp.float32).reshape(n)
    dt_f = jnp.asarray(dt, jnp.float32)
    beta = BETA_MIN + t1 * (BETA_MAX - BETA_MIN)
    a3 = (1.0 - 0.5 * beta * dt_f).reshape(n, 1, 1)

    blk = pl.BlockSpec((tb, tr, LANE), lambda b, c: (b, c, 0))
    coef = pl.BlockSpec((tb, 1, 1), lambda b, c: (b, 0, 0))
    common = dict(
        out_shape=jax.ShapeDtypeStruct(x3.shape, x3.dtype),
        compiler_params=pltpu.CompilerParams(
            dimension_semantics=("parallel", "parallel"),
            vmem_limit_bytes=VMEM_LIMIT_BYTES),
    )

    if last_step:
        out3 = pl.pallas_call(
            _euler_last_kernel,
            grid_spec=pltpu.PrefetchScalarGridSpec(
                num_scalar_prefetch=0, grid=(n // tb, chunks),
                in_specs=[coef, blk], out_specs=blk),
            input_output_aliases={1: 0},   # x_next reuses x's buffer (needs donation)
            **common)(a3, x3)
    else:
        if noise is None:
            raise ValueError("noise (standard normal, same shape as x) is required "
                             "unless last_step=True")
        s3 = jnp.sqrt(beta * jnp.abs(dt_f)).reshape(n, 1, 1)
        dw3 = _to_rows(jnp.asarray(noise).reshape(n, d), rows_pad)
        out3 = pl.pallas_call(
            _euler_kernel,
            grid_spec=pltpu.PrefetchScalarGridSpec(
                num_scalar_prefetch=0, grid=(n // tb, chunks),
                in_specs=[coef, coef, blk, blk], out_specs=blk),
            input_output_aliases={2: 0},
            **common)(a3, s3, x3, dw3)

    return _from_rows(out3, x.shape, d)


# Plain variant: functionally correct standalone, but XLA inserts a defensive copy
# of x before the aliased pallas_call unless the whole sampling loop is jitted.
sde_euler_step = jax.jit(_euler_step_impl, static_argnames=("last_step",))
# In-place variant: donates x so input_output_aliases is a true in-place update.
sde_euler_step_inplace = jax.jit(_euler_step_impl, static_argnames=("last_step",),
                                 donate_argnums=(0,))


@jax.jit
def sde_sample_euler(x, timesteps, noise):
    """Fused K-step Euler-Maruyama sampler (K = len(timesteps) - 1).

    `noise[k]` is the standard-normal draw for step k (shape (K, *x.shape)); the
    last step's noise is ignored (last_step semantics).  x round-trips HBM once;
    per step only the dw block is streamed."""
    n = x.shape[0]
    d = math.prod(x.shape[1:])
    steps = timesteps.shape[0] - 1
    rows_pad, tr, chunks, tb = _layout_plan(n, d, x.dtype.itemsize)
    x3 = _to_rows(x.reshape(n, d), rows_pad)
    dw4 = _to_rows(jnp.asarray(noise).reshape(steps * n, d),
                   rows_pad).reshape(steps, n, rows_pad, LANE)

    ts = jnp.asarray(timesteps, jnp.float32)
    t_cur = ts[:-1]
    dt = ts[1:] - ts[:-1]
    beta = BETA_MIN + t_cur * (BETA_MAX - BETA_MIN)
    a = 1.0 - 0.5 * beta * dt                          # per-step drift coefficient
    sig = jnp.sqrt(beta * jnp.abs(dt))
    sig = sig.at[-1].set(0.0)                          # last step drops the noise

    blk = pl.BlockSpec((tb, tr, LANE), lambda b, c, s: (b, c, 0))
    out3 = pl.pallas_call(
        _fused_euler_kernel,
        out_shape=jax.ShapeDtypeStruct(x3.shape, x3.dtype),
        grid_spec=pltpu.PrefetchScalarGridSpec(
            num_scalar_prefetch=0,
            grid=(n // tb, chunks, steps),
            in_specs=[
                pl.BlockSpec(memory_space=pltpu.MemorySpace.SMEM),   # a   (K,)
                pl.BlockSpec(memory_space=pltpu.MemorySpace.SMEM),   # sig (K,)
                blk,                                                 # x (read once)
                pl.BlockSpec((1, tb, tr, LANE), lambda b, c, s: (s, b, c, 0)),  # dw
            ],
            out_specs=blk,                                           # VMEM-resident
        ),
        compiler_params=pltpu.CompilerParams(
            dimension_semantics=("parallel", "parallel", "arbitrary"),
            vmem_limit_bytes=VMEM_LIMIT_BYTES),
    )(a, sig, x3, dw4)

    return _from_rows(out3, x.shape, d)


# ---------------------------------------------------------------------------
# Demo / verification
# ---------------------------------------------------------------------------
if __name__ == "__main__":
    key = jax.random.PRNGKey(0)
    k1, k2, k3, k4 = jax.random.split(key, 4)

    N, C, H, W = 2, 4, 16, 16
    x = jax.random.normal(k1, (N, C, H, W), dtype=jnp.float32)
    t = jax.random.uniform(k2, (N,), dtype=jnp.float32)
    dt = 0.01

    # ---- forward(x, t) -> (f(x,t), diagonal scale of G(x,t)) ----------------
    f_out, g_scale = sde_forward(x, t)
    f_out = jax.block_until_ready(f_out)
    g_scale = jax.block_until_ready(g_scale)

    beta = BETA_MIN + t.reshape(-1, 1, 1, 1) * (BETA_MAX - BETA_MIN)
    f_ref = -0.5 * beta * x
    g_ref = jnp.sqrt(beta)
    assert jnp.allclose(f_out, f_ref, atol=1e-5, rtol=1e-5)
    assert jnp.allclose(jnp.broadcast_to(g_scale, x.shape),
                        jnp.broadcast_to(g_ref, x.shape), atol=1e-6, rtol=1e-6)

    # ---- last-step Euler update (deterministic): exact check ----------------
    x_last = jax.block_until_ready(sde_euler_step(x, t, dt, last_step=True))
    x_last_ref = x + f_ref * dt
    assert jnp.allclose(x_last, x_last_ref, atol=1e-5, rtol=1e-5)

    # ---- stochastic Euler step with explicit standard-normal noise ----------
    noise = jax.random.normal(k3, x.shape, dtype=jnp.float32)
    x1 = jax.block_until_ready(sde_euler_step(x, t, dt, noise=noise, last_step=False))
    x1_ref = x + f_ref * dt + jnp.sqrt(beta * abs(dt)) * noise
    assert jnp.allclose(x1, x1_ref, atol=1e-5, rtol=1e-5)

    # ---- fused multi-step sampler vs pure-JAX reference loop ----------------
    timesteps = jnp.linspace(0.0, 0.1, 6)          # 5 Euler steps
    S = timesteps.shape[0] - 1
    dw_all = jax.random.normal(k4, (S,) + x.shape, dtype=jnp.float32)
    x_fused = jax.block_until_ready(sde_sample_euler(x, timesteps, dw_all))
    xr = x
    for s in range(S):
        t_s = timesteps[s]
        dt_s = timesteps[s + 1] - timesteps[s]
        b_s = BETA_MIN + t_s * (BETA_MAX - BETA_MIN)
        xr = xr + (-0.5 * b_s * xr) * dt_s
        if s != S - 1:
            xr = xr + jnp.sqrt(b_s * jnp.abs(dt_s)) * dw_all[s]
    assert jnp.allclose(x_fused, xr, atol=1e-4, rtol=1e-4)

    # ---- bf16 I/O smoke check (half the HBM traffic) -------------------------
    xb = x.astype(jnp.bfloat16)
    fb, _ = sde_forward(xb, t)
    fb = jax.block_until_ready(fb)
    assert fb.dtype == jnp.bfloat16
    assert jnp.allclose(fb.astype(jnp.float32), f_ref, atol=5e-2, rtol=5e-2)

    print("KERNEL_OK")
</pallas_src>

<mosaic_0001>
module attributes {stable_mosaic.version = 11 : i64} {
  func.func @_drift_kernel(%arg0: i32, %arg1: i32, %arg2: memref<1x1x1xf32, #tpu.memory_space<vmem>>, %arg3: memref<1x8x128xf32, #tpu.memory_space<vmem>>, %arg4: memref<1x8x128xf32, #tpu.memory_space<vmem>>) attributes {dimension_semantics = [#tpu.dimension_semantics<parallel>, #tpu.dimension_semantics<parallel>], iteration_bounds = array<i64: 2, 1>, scalar_prefetch = 0 : i64, scratch_operands = 0 : i64, tpu.core_type = #tpu.core_type<tc>, window_params = [{transform_indices = @transform_0, window_bounds = array<i64: 1, 1, 1>}, {transform_indices = @transform_1, window_bounds = array<i64: 1, 8, 128>}, {transform_indices = @transform_2, window_bounds = array<i64: 1, 8, 128>}]} {
    %c0 = arith.constant 0 : index
    %c0_0 = arith.constant 0 : index
    %c0_1 = arith.constant 0 : index
    %0 = vector.load %arg2[%c0, %c0_0, %c0_1] : memref<1x1x1xf32, #tpu.memory_space<vmem>>, vector<1x1x1xf32>
    %cst = arith.constant 1.990000e+01 : f32
    %1 = vector.broadcast %cst : f32 to vector<1x1x1xf32>
    %2 = arith.mulf %0, %1 : vector<1x1x1xf32>
    %cst_2 = arith.constant 1.000000e-01 : f32
    %3 = vector.broadcast %cst_2 : f32 to vector<1x1x1xf32>
    %4 = arith.addf %3, %2 : vector<1x1x1xf32>
    %c0_3 = arith.constant 0 : index
    %c0_4 = arith.constant 0 : index
    %c0_5 = arith.constant 0 : index
    %5 = vector.load %arg3[%c0_3, %c0_4, %c0_5] : memref<1x8x128xf32, #tpu.memory_space<vmem>>, vector<1x8x128xf32>
    %cst_6 = arith.constant -5.000000e-01 : f32
    %6 = vector.broadcast %cst_6 : f32 to vector<1x1x1xf32>
    %7 = arith.mulf %6, %4 : vector<1x1x1xf32>
    %8 = vector.broadcast %7 : vector<1x1x1xf32> to vector<1x8x128xf32>
    %9 = arith.mulf %8, %5 : vector<1x8x128xf32>
    %c0_7 = arith.constant 0 : index
    %c0_8 = arith.constant 0 : index
    %c0_9 = arith.constant 0 : index
    %10 = vector.load %arg4[%c0_7, %c0_8, %c0_9] : memref<1x8x128xf32, #tpu.memory_space<vmem>>, vector<1x8x128xf32>
    tpu.vector_store %arg4[%c0_7, %c0_8, %c0_9], %9 {strides = array<i32>} : memref<1x8x128xf32, #tpu.memory_space<vmem>>, vector<1x8x128xf32>,
    return
  }
  func.func @transform_0(%arg0: i32, %arg1: i32) -> (i32, i32, i32) {
    %c0_i32 = arith.constant 0 : i32
    %c0_i32_0 = arith.constant 0 : i32
    %c0_i32_1 = arith.constant 0 : i32
    return %arg0, %c0_i32, %c0_i32_0 : i32, i32, i32
  }
  func.func @transform_1(%arg0: i32, %arg1: i32) -> (i32, i32, i32) {
    %c0_i32 = arith.constant 0 : i32
    %c0_i32_0 = arith.constant 0 : i32
    return %arg0, %arg1, %c0_i32 : i32, i32, i32
  }
  func.func @transform_2(%arg0: i32, %arg1: i32) -> (i32, i32, i32) {
    %c0_i32 = arith.constant 0 : i32
    %c0_i32_0 = arith.constant 0 : i32
    return %arg0, %arg1, %c0_i32 : i32, i32, i32
  }
}

</mosaic_0001>

<bundles_post_ra>
// kernel: sde_forward.1
= control target key start
LH: loop header
LB: loop body
LE: loop exit
PB: predicated region body
PF: predicated region fallthrough
CT: control target
= control target key end

     0   :  { %s358_s9 = smov 0   ;;  %s360_s10 = smov 0   ;;  %s391_s0 = inlined_call_operand.vmem [shape: f32[2,1,1], index: 0, kind: input, shape index: {}]   ;;  %s392_s1 = inlined_call_operand.vmem [shape: f32[2,8,128], index: 1, kind: input, shape index: {}]   ;;  %s393_s2 = inlined_call_operand.vmem [shape: f32[2,8,128], index: 2, kind: output, shape index: {}]  }
   0x1   :  { %s362_s11 = smov 0  }
   0x2 LB: > { %s24_s12 = sadd.s32 1, %s336_s10  ;;  %p287_p0 = scmp.ge.s32.totalorder %s340_s11, 1  ;;  %s340_s11 = sphi %s362_s11, %s12_s11   ;;  %s336_s10 = sphi %s360_s10, %s395_s10   ;;  %s332_s9 = sphi %s358_s9, %s394_s9  }
   0x3   : > { %p26_p1 = scmp.ge.s32.totalorder %s24_s12, 2  ;;  %p138_p2 = scmp.lt.s32.totalorder %s340_s11, 3 }
   0x5   : > { %s397_s12 = smov (%p26_p1, %s24_s12), 0  ;;  %p139_p3 = pnand %p287_p0, %p138_p2 }
   0x6   : > { %p167_p4 = scmp.lt.s32.totalorder (!%p139_p3), %s332_s9, 1 }
   0x7   : > { %142 = sbr.rel (%p139_p3) target bundleno = 150 (0x96), region = 28 }
   0xc   : > { %v190_v0 = vlaneseq  ;;  %v342_v1 = vmov 0   ;;  %s399_s9 = smov (!%p167_p4, %s332_s9), 1 }
   0xd   : > { %317 = vset.pattern.permute.xlu0 %v342_v1  ;;  %s169_s15 = scalar_lea.vmem %s391_s0, %s399_s9  ;;  %s288_s16 = sshll.u32 %s399_s9, 3 }
   0xe   : > { %v191_v2 = vshrl.u32 %v190_v0, 7  ;;  %v184_v3 = vld [vmem:[%s169_s15] sm:$0x1]  ;;  %s176_s19 = scalar_lea.vmem %s392_s1, %s288_s16  ;;  %s183_s22 = scalar_lea.vmem %s393_s2, %s288_s16 }
   0xf   : > { %v185_v4 = vmul.f32 19.9, %v184_v3  ;;  %v187_v9 = vld [vmem:[%s176_s19] sm:$0xff] }
  0x10   : > { %v192_v6 = vsub.s32 0, %v191_v2 }
  0x11   : > { %v186_v5 = vadd.f32 0.1, %v185_v4 }
  0x13   : > { %v188_v7 = vmul.f32 -0.5, %v186_v5 }
  0x15   : > { %v193_v8 = vrot.slane %v188_v7, %v192_v6 }
  0x17   : > { %195 = vperm.xlu0 %317, %v193_v8  }
  0x92   : > { %v196_v10 = vpop.permute.xlu0 %195 }
  0x93   : > { %v198_v11 = vmul.f32 %v196_v10, %v187_v9 }
  0x95   : > { %199 = vst [vmem:[%s183_s22] sm:$0xff] %v198_v11 }
  0x96 PF: > { %s12_s11 = sadd.s32 1, %s340_s11   ;;  %s394_s9 = smov %s336_s10 }
  0x97   : > { %p9_p5 = scmp.ge.s32.totalorder %s12_s11, 4   ;;  %s395_s10 = smov %s397_s12 }
  0x99   :  { %11 = sbr.rel (!%p9_p5) target bundleno = 2 (0x2), region = 61 }

</bundles_post_ra>
